<compile_context>
chip_gen: v7x
topology: tpu7x:2x2x1
jax: 0.10.0
libtpu: 0.0.40
codegen_flags: <defaults>
</compile_context>

<pallas_src>
import functools

import jax
import jax.numpy as jnp
from jax.experimental import pallas as pl
from jax.experimental.pallas import tpu as pltpu

_LANE = 512          # lane-dense width (multiple of 128)
_MAX_ROW_TILE = 512  # rows per block -> 512*512*4 B = 1 MiB per f32 buffer


def _gaussian_noise_kernel(x_ref, bits_ref, o_ref, *, sigma):
    bits = bits_ref[...]                      # (rows, LANE) uint32
    half = bits.shape[0] // 2                 # rows is a multiple of 16 -> vreg-aligned split

    # Exponent-bit trick: floats in [1, 2) with a 23-bit uniform mantissa.
    one_exp = jnp.uint32(0x3F800000)
    f1 = jax.lax.bitcast_convert_type((bits[:half] >> 9) | one_exp, jnp.float32)
    f2 = jax.lax.bitcast_convert_type((bits[half:] >> 9) | one_exp, jnp.float32)
    u1 = 2.0 - f1                             # (0, 1]  -> log-safe
    u2 = f2 - 1.0                             # [0, 1)

    # Box-Muller, using both outputs: one pair of uniforms -> two normals.
    r = jnp.sqrt(-2.0 * jnp.log(u1))
    theta = (2.0 * jnp.pi) * u2
    z = jnp.concatenate([r * jnp.cos(theta), r * jnp.sin(theta)], axis=0)

    # out = x + (sigma * x) * z  ==  x * (1 + sigma * z)
    o_ref[...] = x_ref[...] * (1.0 + sigma * z).astype(o_ref.dtype)


def gaussian_noise(x, key, *, sigma=0.1, is_relative_detach=True, training=True):
    """Forward pass of GaussianNoise. `key` is a jax.random key for the noise."""
    # TODO(synk): is_relative_detach only changes gradient flow (detach); forward
    # values are identical, so it is unused here.
    del is_relative_detach
    if (not training) or sigma == 0:
        return x

    orig_shape = x.shape
    total = x.size

    rows = pl.cdiv(total, _LANE)
    # Row tile must be a multiple of 16 so the in-kernel sublane split into the
    # two Box-Muller halves stays vreg-aligned (no cross-sublane shuffles).
    r_tile = min(_MAX_ROW_TILE, ((rows + 15) // 16) * 16)
    rows_padded = pl.cdiv(rows, r_tile) * r_tile
    padded_total = rows_padded * _LANE

    x_flat = x.reshape(-1)
    if padded_total != total:
        x_flat = jnp.pad(x_flat, (0, padded_total - total))
    x2 = x_flat.reshape(rows_padded, _LANE)

    # One 32-bit random word per element (both Box-Muller outputs are used).
    bits = jax.random.bits(key, (rows_padded, _LANE), dtype=jnp.uint32)

    kernel = functools.partial(_gaussian_noise_kernel, sigma=float(sigma))
    out2 = pl.pallas_call(
        kernel,
        out_shape=jax.ShapeDtypeStruct((rows_padded, _LANE), x.dtype),
        grid=(rows_padded // r_tile,),
        in_specs=[
            pl.BlockSpec((r_tile, _LANE), lambda i: (i, 0)),   # x tile
            pl.BlockSpec((r_tile, _LANE), lambda i: (i, 0)),   # random-bits tile
        ],
        out_specs=pl.BlockSpec((r_tile, _LANE), lambda i: (i, 0)),
        compiler_params=pltpu.CompilerParams(
            dimension_semantics=("parallel",)),
    )(x2, bits)

    out_flat = out2.reshape(-1)
    if padded_total != total:
        out_flat = out_flat[:total]
    return out_flat.reshape(orig_shape)


if __name__ == "__main__":
    root = jax.random.PRNGKey(0)
    kx, knoise = jax.random.split(root)
    # Small NCHW input consistent with a VAE feature map.
    x = jax.random.normal(kx, (2, 4, 16, 16), dtype=jnp.float32)

    y = gaussian_noise(x, knoise, sigma=0.1, is_relative_detach=True, training=True)
    y = jax.block_until_ready(y)

    # Shape / dtype preserved, finite output.
    assert y.shape == x.shape and y.dtype == x.dtype
    assert bool(jnp.all(jnp.isfinite(y)))

    # Relative noise: (y - x) / (sigma * x) should look like N(0, 1).
    z_est = (y - x) / (0.1 * x)
    assert float(jnp.max(jnp.abs(z_est))) < 10.0          # well inside 10 sigma
    assert abs(float(jnp.mean(z_est))) < 0.15
    assert 0.8 < float(jnp.std(z_est)) < 1.2

    # Eval mode and sigma == 0 must be identity.
    y_eval = gaussian_noise(x, knoise, sigma=0.1, training=False)
    assert bool(jnp.all(y_eval == x))
    y_zero = gaussian_noise(x, knoise, sigma=0.0, training=True)
    assert bool(jnp.all(y_zero == x))

    print("KERNEL_OK")
</pallas_src>

<mosaic_0001>
module attributes {stable_mosaic.version = 11 : i64} {
  func.func @_gaussian_noise_kernel(%arg0: i32, %arg1: memref<16x512xf32, #tpu.memory_space<vmem>>, %arg2: memref<16x512xi32, #tpu.memory_space<vmem>>, %arg3: memref<16x512xf32, #tpu.memory_space<vmem>>) attributes {dimension_semantics = [#tpu.dimension_semantics<parallel>], iteration_bounds = array<i64: 1>, scalar_prefetch = 0 : i64, scratch_operands = 0 : i64, tpu.core_type = #tpu.core_type<tc>, window_params = [{transform_indices = @transform_0, window_bounds = array<i64: 16, 512>}, {transform_indices = @transform_1, window_bounds = array<i64: 16, 512>}, {transform_indices = @transform_2, window_bounds = array<i64: 16, 512>}]} {
    %c0 = arith.constant 0 : index
    %c0_0 = arith.constant 0 : index
    %0 = vector.load %arg2[%c0, %c0_0] : memref<16x512xi32, #tpu.memory_space<vmem>>, vector<16x512xi32>
    %1 = vector.extract_strided_slice %0 {offsets = [0, 0], sizes = [8, 512], strides = [1, 1]} : vector<16x512xi32> to vector<8x512xi32>
    %c9_i32 = arith.constant 9 : i32
    %2 = vector.broadcast %c9_i32 : i32 to vector<8x512xi32>
    %3 = arith.shrui %1, %2 : vector<8x512xi32>
    %c1065353216_i32 = arith.constant 1065353216 : i32
    %4 = vector.broadcast %c1065353216_i32 : i32 to vector<8x512xi32>
    %5 = arith.ori %3, %4 : vector<8x512xi32>
    %6 = tpu.bitcast %5 : vector<8x512xi32> -> vector<8x512xf32>
    %7 = vector.extract_strided_slice %0 {offsets = [8, 0], sizes = [8, 512], strides = [1, 1]} : vector<16x512xi32> to vector<8x512xi32>
    %c9_i32_1 = arith.constant 9 : i32
    %8 = vector.broadcast %c9_i32_1 : i32 to vector<8x512xi32>
    %9 = arith.shrui %7, %8 : vector<8x512xi32>
    %c1065353216_i32_2 = arith.constant 1065353216 : i32
    %10 = vector.broadcast %c1065353216_i32_2 : i32 to vector<8x512xi32>
    %11 = arith.ori %9, %10 : vector<8x512xi32>
    %12 = tpu.bitcast %11 : vector<8x512xi32> -> vector<8x512xf32>
    %cst = arith.constant 2.000000e+00 : f32
    %13 = vector.broadcast %cst : f32 to vector<8x512xf32>
    %14 = arith.subf %13, %6 : vector<8x512xf32>
    %cst_3 = arith.constant 1.000000e+00 : f32
    %15 = vector.broadcast %cst_3 : f32 to vector<8x512xf32>
    %16 = arith.subf %12, %15 : vector<8x512xf32>
    %17 = math.log %14 : vector<8x512xf32>
    %cst_4 = arith.constant -2.000000e+00 : f32
    %18 = vector.broadcast %cst_4 : f32 to vector<8x512xf32>
    %19 = arith.mulf %18, %17 : vector<8x512xf32>
    %20 = math.sqrt %19 : vector<8x512xf32>
    %cst_5 = arith.constant 6.28318548 : f32
    %21 = vector.broadcast %cst_5 : f32 to vector<8x512xf32>
    %22 = arith.mulf %21, %16 : vector<8x512xf32>
    %23 = math.cos %22 : vector<8x512xf32>
    %24 = arith.mulf %20, %23 : vector<8x512xf32>
    %25 = math.sin %22 : vector<8x512xf32>
    %26 = arith.mulf %20, %25 : vector<8x512xf32>
    %27 = tpu.concatenate %24, %26 in 0 : vector<8x512xf32>, vector<8x512xf32> -> vector<16x512xf32>
    %c0_6 = arith.constant 0 : index
    %c0_7 = arith.constant 0 : index
    %28 = vector.load %arg1[%c0_6, %c0_7] : memref<16x512xf32, #tpu.memory_space<vmem>>, vector<16x512xf32>
    %cst_8 = arith.constant 1.000000e-01 : f32
    %29 = vector.broadcast %cst_8 : f32 to vector<16x512xf32>
    %30 = arith.mulf %29, %27 : vector<16x512xf32>
    %cst_9 = arith.constant 1.000000e+00 : f32
    %31 = vector.broadcast %cst_9 : f32 to vector<16x512xf32>
    %32 = arith.addf %31, %30 : vector<16x512xf32>
    %33 = arith.mulf %28, %32 : vector<16x512xf32>
    %c0_10 = arith.constant 0 : index
    %c0_11 = arith.constant 0 : index
    %34 = vector.load %arg3[%c0_10, %c0_11] : memref<16x512xf32, #tpu.memory_space<vmem>>, vector<16x512xf32>
    tpu.vector_store %arg3[%c0_10, %c0_11], %33 {strides = array<i32>} : memref<16x512xf32, #tpu.memory_space<vmem>>, vector<16x512xf32>,
    return
  }
  func.func @transform_0(%arg0: i32) -> (i32, i32) {
    %c0_i32 = arith.constant 0 : i32
    %c0_i32_0 = arith.constant 0 : i32
    return %arg0, %c0_i32 : i32, i32
  }
  func.func @transform_1(%arg0: i32) -> (i32, i32) {
    %c0_i32 = arith.constant 0 : i32
    %c0_i32_0 = arith.constant 0 : i32
    return %arg0, %c0_i32 : i32, i32
  }
  func.func @transform_2(%arg0: i32) -> (i32, i32) {
    %c0_i32 = arith.constant 0 : i32
    %c0_i32_0 = arith.constant 0 : i32
    return %arg0, %c0_i32 : i32, i32
  }
}

</mosaic_0001>

<bundles_post_ra>
// kernel: tpu_custom_call.1
= control target key start
LH: loop header
LB: loop body
LE: loop exit
PB: predicated region body
PF: predicated region fallthrough
CT: control target
= control target key end

     0   :  { %7 = vsyncpa [#allocation3], 0  ;;  %s1674_s0 = inlined_call_operand.hbm [shape: f32[16,512], index: 0, kind: input, shape index: {}]   ;;  %s1675_s1 = inlined_call_operand.hbm [shape: u32[16,512], index: 1, kind: input, shape index: {}]   ;;  %s1676_s2 = inlined_call_operand.hbm [shape: f32[16,512], index: 2, kind: output, shape index: {}]  }
   0x1   :  { %8 = vsyncpa [#allocation6], 0 }
   0x2   :  { %9 = vsyncpa [#allocation4], 0  ;;  %s1185_s9 = smov [#allocation2]   ;;  %s1113_s13 = scalar_lea.hbm %s1674_s0, 1024 }
   0x3   :  { %s15_s10 = sshll.u32 %s1185_s9, 4  ;;  %p1114_p0 = scmp.ne.s32.totalorder %s1674_s0, %s1113_s13  ;;  %s16_s10 = int_to_ptr.vmem [resolvable:$true] %s15_s10 }
   0x4   :  { %p1117_p1 = scmp.lt.u32.totalorder %s1113_s13, %s1674_s0 }
   0x6   :  { %p1119_p2 = pnand %p1117_p1, %p1114_p0 }
   0x8   :  { %1122 = shalt.err (!%p1119_p2)
}
   0x9   :  { %s1123_s18 = scalar_lea.vmem %s16_s10, 1024  ;;  %p1128_p4 = scmp.lt.s32.totalorder %s16_s10, %s16_s10 }
   0xa   :  { %p1124_p3 = scmp.ne.s32.totalorder %s16_s10, %s1123_s18  ;;  %p1129_p5 = scmp.lt.s32.totalorder %s1123_s18, %s1123_s18 }
   0xc   :  { %p1130_p6 = por %p1129_p5, %p1128_p4 }
   0xe   :  { %p1131_p7 = pnand %p1130_p6, %p1124_p3 }
  0x10   :  { %1134 = shalt.err (!%p1131_p7)
}
  0x11   :  { %s1186_s19 = smov 512   ;;  %s1187_s20 = smov 32  }
  0x12   :  { %21 = dma.hbm_to_vmem [thread:$0]  %s1674_s0, 1024, %s16_s10, [#allocation3], %s1186_s19, %s1186_s19, %s1187_s20  }
  0x13   :  { %s1188_s23 = smov [#allocation5]   ;;  %s1135_s27 = scalar_lea.hbm %s1675_s1, 1024 }
  0x14   :  { %s27_s24 = sshll.u32 %s1188_s23, 4  ;;  %p1136_p8 = scmp.ne.s32.totalorder %s1675_s1, %s1135_s27  ;;  %s28_s24 = int_to_ptr.vmem [resolvable:$true] %s27_s24 }
  0x15   :  { %p1139_p9 = scmp.lt.u32.totalorder %s1135_s27, %s1675_s1 }
  0x17   :  { %p1141_p10 = pnand %p1139_p9, %p1136_p8 }
  0x19   :  { %1144 = shalt.err (!%p1141_p10)
}
  0x1a   :  { %s1145_s4 = scalar_lea.vmem %s28_s24, 1024  ;;  %p1150_p12 = scmp.lt.s32.totalorder %s28_s24, %s28_s24 }
  0x1b   :  { %p1146_p11 = scmp.ne.s32.totalorder %s28_s24, %s1145_s4  ;;  %p1151_p13 = scmp.lt.s32.totalorder %s1145_s4, %s1145_s4 }
  0x1d   :  { %p1152_p0 = por %p1151_p13, %p1150_p12 }
  0x1f   :  { %p1153_p1 = pnand %p1152_p0, %p1146_p11 }
  0x21   :  { %1156 = shalt.err (!%p1153_p1)
}
  0x22   :  { %33 = dma.hbm_to_vmem [thread:$0]  %s1675_s1, 1024, %s28_s24, [#allocation6], %s1186_s19, %s1186_s19, %s1187_s20  }
  0x23   :  { %1179 = dma.done.wait [#allocation3], 1024  }
  0x24   :  { %1180 = vsyncadd [#allocation3], 4294966272 }
  0x25   :  { %1181 = dma.done.wait [#allocation6], 1024  }
  0x26   :  { %1182 = vsyncadd [#allocation6], 4294966272  ;;  %v40_v0 = vld [vmem:[#allocation5] sm:$0xff]  ;;  %v45_v4 = vld [vmem:[#allocation5 + $0x28] sm:$0xff]  ;;  %v1189_v44 = vmov 683565275  }
  0x27   :  { %v44_v1 = vld [vmem:[#allocation5 + $0x20] sm:$0xff]  ;;  %v48_v2 = vshrl.u32 %v40_v0, 9  ;;  %v61_v5 = vshrl.u32 %v45_v4, 9  ;;  %v41_v11 = vld [vmem:[#allocation5 + $0x8] sm:$0xff]  ;;  %v46_v14 = vld [vmem:[#allocation5 + $0x30] sm:$0xff]  ;;  %s1195_s1 = smov [#allocation7]  }
  0x28   :  { %v60_v3 = vshrl.u32 %v44_v1, 9  ;;  %v49_v15 = vshrl.u32 %v41_v11, 9  ;;  %v62_v20 = vshrl.u32 %v46_v14, 9  ;;  %v42_v25 = vld [vmem:[#allocation5 + $0x10] sm:$0xff]  ;;  %v1190_v46 = vmov 2475754826  }
  0x29   :  { %v52_v6 = vor.u32 1065353216, %v48_v2  ;;  %v65_v8 = vor.u32 1065353216, %v61_v5  ;;  %v50_v33 = vshrl.u32 %v42_v25, 9  ;;  %v1191_v48 = vmov 2131351028   ;;  %s1005_s6 = sshll.u32 %s1195_s1, 4  ;;  %s1006_s6 = int_to_ptr.vmem [resolvable:$true] %s1005_s6 }
  0x2a   :  { %v64_v7 = vor.u32 1065353216, %v60_v3  ;;  %v53_v22 = vor.u32 1065353216, %v49_v15  ;;  %v66_v28 = vor.u32 1065353216, %v62_v20  ;;  %v1192_v57 = vmov 2102212464   ;;  %s1157_s7 = scalar_lea.vmem %s1006_s6, 1024  ;;  %p1162_p3 = scmp.lt.s32.totalorder %s1006_s6, %s1006_s6 }
  0x2b   :  { %v72_v9 = vsub.f32 2.0, %v52_v6  ;;  %v1019_v12 = vadd.f32 -1.0, %v65_v8  ;;  %v1255_v42 = vor.u32 1065353216, %v50_v33  ;;  %v1193_v60 = vmov 920167782   ;;  %p1158_p2 = scmp.ne.s32.totalorder %s1006_s6, %s1157_s7  ;;  %p1163_p4 = scmp.lt.s32.totalorder %s1157_s7, %s1157_s7 }
  0x2c   :  { %v1018_v10 = vadd.f32 -1.0, %v64_v7  ;;  %v73_v30 = vsub.f32 2.0, %v53_v22  ;;  %v1020_v36 = vadd.f32 -1.0, %v66_v28  ;;  %v1194_v63 = vmov 1326507024  }
  0x2d   :  { %v1243_v16 = vmul.f32 6.2831855, %v1019_v12  ;;  %1081 = vlog2.f32 %v72_v9  ;;  %p1164_p5 = por %p1163_p4, %p1162_p3 }
  0x2e   :  { %v1241_v13 = vmul.f32 6.2831855, %v1018_v10  ;;  %1083 = vlog2.f32 %v73_v30  ;;  %v1264_v53 = vmul.f32 6.2831855, %v1020_v36 }
  0x2f   :  { %v230_v19 = vand.u32 2139095040, %v1243_v16  ;;  %v227_v31 = vand.u32 2147483647, %v1243_v16  ;;  %p1165_p6 = pnand %p1164_p5, %p1158_p2 }
  0x30   :  { %v127_v17 = vand.u32 2139095040, %v1241_v13  ;;  %v124_v18 = vand.u32 2147483647, %v1241_v13  ;;  %vm126_vm15 = vcmp.lt.s32.totalorder %v1241_v13, 0 }
  0x31   :  { %v231_v23 = vshrl.u32 %v230_v19, 23  ;;  %v1253_v41 = vand.u32 8388607, %v227_v31  ;;  %v1275_v19 = vld [vmem:[#allocation5 + $0x38] sm:$0xff] }
  0x32   :  { %v128_v21 = vshrl.u32 %v127_v17, 23  ;;  %v131_v26 = vand.u32 8388607, %v124_v18  ;;  %v63_v33 = vshrl.u32 %v1275_v19, 9 }
  0x33   :  { %v1026_v27 = vadd.s32 4294967169, %v231_v23  ;;  %v235_v17 = vor.u32 8388608, %v1253_v41 }
  0x34   :  { %v1022_v24 = vadd.s32 4294967169, %v128_v21  ;;  %v132_v34 = vor.u32 8388608, %v131_v26 }
  0x35   :  { %v237_v32 = vadd.s32 1, %v1026_v27 }
  0x36   :  { %v134_v29 = vadd.s32 1, %v1022_v24  ;;  %v1260_v51 = vshll.u32 %v132_v34, 8 }
  0x37   :  { %vm238_vm1 = vcmp.gt.s32.totalorder %v237_v32, 0  ;;  %v1082_v37 = vpop.eup %1081 }
  0x38   :  { %vm135_vm0 = vcmp.gt.s32.totalorder %v134_v29, 0  ;;  %v239_v39 = vsel %vm238_vm1, %v237_v32, 0  ;;  %v81_v50 = vmul.f32 0.6931472, %v1082_v37  ;;  %v1084_v20 = vpop.eup %1083  ;;  %v74_v32 = vsub.f32 2.0, %v1255_v42 }
  0x39   :  { %v136_v35 = vsel %vm135_vm0, %v134_v29, 0  ;;  %v1262_v52 = vand.u32 31, %v239_v39  ;;  %v240_v36 = vshrl.u32 %v239_v39, 5  ;;  %v333_v39 = vand.u32 2139095040, %v1264_v53 }
  0x3a   :  { %v138_v38 = vand.u32 31, %v136_v35  ;;  %v137_v40 = vshrl.u32 %v136_v35, 5  ;;  %v1290_v29 = vmul.f32 -2.0, %v81_v50  ;;  %v83_v35 = vmul.f32 0.6931472, %v1084_v20 }
  0x3b   :  { %v242_v24 = vsub.s32 32, %v1262_v52  ;;  %v244_v30 = vshll.u32 %v1189_v44, %v1262_v52  ;;  %v250_v41 = vshll.u32 %v1191_v48, %v1262_v52  ;;  %vm259_vm7 = vcmp.lt.s32.totalorder %v240_v36, 1 }
  0x3c   :  { %v139_v43 = vsub.s32 32, %v138_v38  ;;  %v141_v45 = vshll.u32 %v1189_v44, %v138_v38  ;;  %v144_v47 = vshll.u32 %v1190_v46, %v138_v38  ;;  %v147_v49 = vshll.u32 %v1191_v48, %v138_v38 }
  0x3d   :  { %v150_v59 = vshll.u32 %v1192_v57, %v138_v38  ;;  %v153_v62 = vshll.u32 %v1193_v60, %v138_v38  ;;  %vm156_vm2 = vcmp.lt.s32.totalorder %v137_v40, 1  ;;  %vm157_vm3 = vcmp.lt.s32.totalorder %v137_v40, 2 }
  0x3e   :  { %v140_v54 = vshrl.u32 %v1189_v44, %v139_v43  ;;  %v142_v55 = vshrl.u32 %v1190_v46, %v139_v43  ;;  %v145_v56 = vshrl.u32 %v1191_v48, %v139_v43  ;;  %v148_v58 = vshrl.u32 %v1192_v57, %v139_v43 }
  0x3f   :  { %v151_v61 = vshrl.u32 %v1193_v60, %v139_v43  ;;  %v154_v0 = vshrl.u32 %v1194_v63, %v139_v43  ;;  %vm158_vm4 = vcmp.lt.s32.totalorder %v137_v40, 3  ;;  %vm159_vm5 = vcmp.lt.s32.totalorder %v137_v40, 4 }
  0x40   :  { %v143_v1 = vor.u32 %v142_v55, %v141_v45  ;;  %v146_v2 = vor.u32 %v145_v56, %v144_v47  ;;  %v149_v3 = vor.u32 %v148_v58, %v147_v49  ;;  %v245_v37 = vshrl.u32 %v1190_v46, %v242_v24 }
  0x41   :  { %v152_v4 = vor.u32 %v151_v61, %v150_v59  ;;  %v155_v5 = vor.u32 %v154_v0, %v153_v62  ;;  %v247_v38 = vshll.u32 %v1190_v46, %v1262_v52  ;;  %v248_v40 = vshrl.u32 %v1191_v48, %v242_v24 }
  0x42   :  { %v160_v6 = vsel %vm156_vm2, %v140_v54, %v143_v1  ;;  %v164_v7 = vsel %vm156_vm2, %v143_v1, %v146_v2  ;;  %v168_v8 = vsel %vm156_vm2, %v146_v2, %v149_v3  ;;  %v161_v9 = vsel %vm159_vm5, %v149_v3, 2102212464 }
  0x43   :  { %v165_v10 = vsel %vm159_vm5, %v152_v4, 920167782  ;;  %v169_v11 = vsel %vm159_vm5, %v155_v5, 1326507024  ;;  %v162_v12 = vsel %vm158_vm4, %v146_v2, %v161_v9  ;;  %v251_v43 = vshrl.u32 %v1192_v57, %v242_v24 }
  0x44   :  { %v166_v14 = vsel %vm158_vm4, %v149_v3, %v165_v10  ;;  %v170_v15 = vsel %vm158_vm4, %v152_v4, %v169_v11  ;;  %v163_v21 = vsel %vm157_vm3, %v160_v6, %v162_v12  ;;  %v1307_v45 = vshll.u32 %v235_v17, 8 }
  0x45   :  { %v167_v22 = vsel %vm157_vm3, %v164_v7, %v166_v14  ;;  %v171_v23 = vsel %vm157_vm3, %v168_v8, %v170_v15  ;;  %v179_v34 = vmul.u32 %v1260_v51, %v163_v21  ;;  %1085 = vrsqrt.f32 %v1290_v29 }
  0x46   :  { %v1282_v25 = vmul.u32.u64.low %v1260_v51, %v171_v23  ;;  %v1283_v26 = vmul.u32.u64.high %v1260_v51, %v171_v23, %v1282_v25  ;;  %v1286_v27 = vmul.u32.u64.low %v1260_v51, %v167_v22  ;;  %v1287_v28 = vmul.u32.u64.high %v1260_v51, %v167_v22, %v1286_v27 }
  0x47   :  { %v246_v47 = vor.u32 %v245_v37, %v244_v30  ;;  %v249_v49 = vor.u32 %v248_v40, %v247_v38  ;;  %v252_v50 = vor.u32 %v251_v43, %v250_v41  ;;  %v253_v54 = vshll.u32 %v1192_v57, %v1262_v52  ;;  %v1343_v37 = vld [vmem:[#allocation5 + $0x18] sm:$0xff] }
  0x48   :  { %vm181_vm6 = vc.u32 %v1283_v26, %v1286_v27  ;;  %v182_v42 = vadd.s32 1, %v1287_v28  ;;  %v254_v55 = vshrl.u32 %v1193_v60, %v242_v24  ;;  %v256_v56 = vshll.u32 %v1193_v60, %v1262_v52 }
  0x49   :  { %v1317_v59 = vmul.f32 -2.0, %v83_v35  ;;  %v257_v61 = vshrl.u32 %v1194_v63, %v242_v24  ;;  %v243_v62 = vshrl.u32 %v1189_v44, %v242_v24  ;;  %vm261_vm8 = vcmp.lt.s32.totalorder %v240_v36, 3 }
  0x4a   :  { %v183_v51 = vsel %vm181_vm6, %v182_v42, %v1287_v28  ;;  %v255_v0 = vor.u32 %v254_v55, %v253_v54  ;;  %vm262_vm9 = vcmp.lt.s32.totalorder %v240_v36, 4  ;;  %vm260_vm10 = vcmp.lt.s32.totalorder %v240_v36, 2 }
  0x4b   :  { %v184_v58 = vadd.s32 %v183_v51, %v179_v34  ;;  %v258_v2 = vor.u32 %v257_v61, %v256_v56  ;;  %v334_v3 = vshrl.u32 %v333_v39, 23  ;;  %v264_v4 = vsel %vm262_vm9, %v252_v50, 2102212464 }
  0x4c   :  { %v267_v5 = vsel %vm259_vm7, %v246_v47, %v249_v49  ;;  %v268_v6 = vsel %vm262_vm9, %v255_v0, 920167782  ;;  %v271_v52 = vsel %vm259_vm7, %v249_v49, %v252_v50  ;;  %1087 = vlog2.f32 %v74_v32 }
  0x4d   :  { %v185_v1 = vadd.s32 536870912, %v184_v58  ;;  %v269_v8 = vsel %vm261_vm8, %v252_v50, %v268_v6  ;;  %v272_v9 = vsel %vm262_vm9, %v258_v2, 1326507024  ;;  %1089 = vrsqrt.f32 %v1317_v59 }
  0x4e   :  { %v263_v10 = vsel %vm259_vm7, %v243_v62, %v246_v47  ;;  %v273_v11 = vsel %vm261_vm8, %v255_v0, %v272_v9  ;;  %v265_v14 = vsel %vm261_vm8, %v249_v49, %v264_v4  ;;  %v270_v15 = vsel %vm260_vm10, %v267_v5, %v269_v8 }
  0x4f   :  { %v1323_v7 = vshrl.u32 %v185_v1, 30  ;;  %v274_v17 = vsel %vm260_vm10, %v271_v52, %v273_v11  ;;  %v1030_v21 = vadd.s32 4294967169, %v334_v3  ;;  %v67_v22 = vor.u32 1065353216, %v63_v33  ;;  %v1086_v23 = vpop.eup %1085 }
  0x50   :  { %v1334_v19 = vmul.u32.u64.low %v1307_v45, %v274_v17  ;;  %v1335_v20 = vmul.u32.u64.high %v1307_v45, %v274_v17, %v1334_v19  ;;  %v266_v25 = vsel %vm260_vm10, %v263_v10, %v265_v14  ;;  %v330_v34 = vand.u32 2147483647, %v1264_v53 }
  0x51   :  { %v187_v12 = vshll.u32 %v1323_v7, 30  ;;  %v1339_v28 = vmul.u32.u64.low %v1307_v45, %v270_v15  ;;  %v1340_v30 = vmul.u32.u64.high %v1307_v45, %v270_v15, %v1339_v28  ;;  %v340_v35 = vadd.s32 1, %v1030_v21 }
  0x52   :  { %v1021_v38 = vadd.f32 -1.0, %v67_v22  ;;  %v282_v41 = vmul.u32 %v1307_v45, %v266_v25  ;;  %v93_v33 = vmul.f32 %v1086_v23, %v1290_v29  ;;  %vm94_vm13 = vcmp.eq.f32.partialorder %v1290_v29, inf }
  0x53   :  { %v188_v24 = vsub.s32 %v184_v58, %v187_v12  ;;  %vm284_vm11 = vc.u32 %v1335_v20, %v1339_v28  ;;  %v285_v36 = vadd.s32 1, %v1340_v30  ;;  %vm341_vm12 = vcmp.gt.s32.totalorder %v340_v35, 0 }
  0x54   :  { %v342_v39 = vsel %vm341_vm12, %v340_v35, 0  ;;  %v51_v47 = vshrl.u32 %v1343_v37, 9  ;;  %v337_v45 = vand.u32 8388607, %v330_v34  ;;  %v1354_v54 = vmul.f32 6.2831855, %v1021_v38 }
  0x55   :  { %v190_v32 = vsub.s32 0, %v188_v24  ;;  %v286_v50 = vsel %vm284_vm11, %v285_v36, %v1340_v30  ;;  %v344_v51 = vand.u32 31, %v342_v39  ;;  %v97_v55 = vand.u32 2147483648, %v1290_v29 }
  0x56   :  { %v1088_v43 = vpop.eup %1087  ;;  %v104_v58 = vand.u32 2147483648, %v1317_v59  ;;  %v287_v61 = vadd.s32 %v286_v50, %v282_v41  ;;  %v1359_v62 = vsel %vm94_vm13, %v1290_v29, %v93_v33  ;;  %v180_v0 = vadd.s32 %v1286_v27, %v1283_v26 }
  0x57   :  { %v1023_v40 = vmin.u32 %v190_v32, %v188_v24  ;;  %v1090_v49 = vpop.eup %1089  ;;  %v1363_v1 = vmul.f32 0.6931472, %v1088_v43  ;;  %v345_v2 = vsub.s32 32, %v344_v51  ;;  %v210_v3 = vsub.s32 4, %v1323_v7 }
  0x58   :  { %v1367_v4 = vmul.f32 %v1090_v49, %v1317_v59  ;;  %v288_v5 = vadd.s32 536870912, %v287_v61  ;;  %v1370_v52 = vadd.s32 %v1339_v28, %v1335_v20  ;;  %v338_v8 = vor.u32 8388608, %v337_v45 }
  0x59   :  { %v192_v42 = vclz %v1023_v40  ;;  %v347_v9 = vshll.u32 %v1189_v44, %v344_v51  ;;  %v348_v12 = vshrl.u32 %v1190_v46, %v345_v2  ;;  %v350_v14 = vshll.u32 %v1190_v46, %v344_v51 }
  0x5a   :  { %v1373_v27 = vshrl.u32 %v288_v5, 30  ;;  %v351_v15 = vshrl.u32 %v1191_v48, %v345_v2  ;;  %v356_v17 = vshll.u32 %v1192_v57, %v344_v51  ;;  %v343_v22 = vshrl.u32 %v342_v39, 5 }
  0x5b   :  { %v1024_v56 = vadd.s32 4294967294, %v192_v42  ;;  %v353_v23 = vshll.u32 %v1191_v48, %v344_v51  ;;  %v357_v25 = vshrl.u32 %v1193_v60, %v345_v2  ;;  %v359_v28 = vshll.u32 %v1193_v60, %v344_v51 }
  0x5c   :  { %v290_v20 = vshll.u32 %v1373_v27, 30  ;;  %vm1387_vm0 = vcmp.le.f32.partialorder %v124_v18, 0.7853982  ;;  %v346_v40 = vshrl.u32 %v1189_v44, %v345_v2  ;;  %v349_v41 = vor.u32 %v348_v12, %v347_v9 }
  0x5d   :  { %vm1025_vm14 = vcmp.lt.s32.totalorder %v1024_v56, 0  ;;  %v352_v33 = vor.u32 %v351_v15, %v350_v14  ;;  %v358_v36 = vor.u32 %v357_v25, %v356_v17  ;;  %v360_v43 = vshrl.u32 %v1194_v63, %v345_v2 }
  0x5e   :  { %v195_v6 = vsel %vm1025_vm14, 0, %v1024_v56  ;;  %v1391_v38 = vsub.s32 %v287_v61, %v290_v20  ;;  %vm362_vm1 = vcmp.lt.s32.totalorder %v343_v22, 1  ;;  %vm365_vm2 = vcmp.lt.s32.totalorder %v343_v22, 4 }
  0x5f   :  { %v196_v10 = vsub.s32 32, %v195_v6  ;;  %v197_v11 = vshll.u32 %v188_v24, %v195_v6  ;;  %v200_v26 = vsub.s32 4294967266, %v195_v6  ;;  %v354_v24 = vshrl.u32 %v1192_v57, %v345_v2 }
  0x60   :  { %v293_v49 = vsub.s32 0, %v1391_v38  ;;  %v361_v50 = vor.u32 %v360_v43, %v359_v28  ;;  %v378_v45 = vshll.u32 %v338_v8, 8  ;;  %vm101_vm3 = vcmp.eq.f32.partialorder %v1317_v59, inf }
  0x61   :  { %v198_v19 = vshrl.u32 %v180_v0, %v196_v10  ;;  %v201_v21 = vadd.s32 127, %v200_v26  ;;  %v355_v18 = vor.u32 %v354_v24, %v353_v23  ;;  %vm364_vm4 = vcmp.lt.s32.totalorder %v343_v22, 3 }
  0x62   :  { %v1027_v56 = vmin.u32 %v293_v49, %v1391_v38  ;;  %v436_v61 = vand.u32 2139095040, %v1354_v54  ;;  %vm363_vm5 = vcmp.lt.s32.totalorder %v343_v22, 2  ;;  %v366_v0 = vsel %vm362_vm1, %v346_v40, %v349_v41 }
  0x63   :  { %v199_v32 = vor.u32 %v198_v19, %v197_v11  ;;  %v202_v35 = vshll.u32 %v201_v21, 23  ;;  %v367_v2 = vsel %vm365_vm2, %v355_v18, 2102212464  ;;  %v370_v5 = vsel %vm362_vm1, %v349_v41, %v352_v33 }
  0x64   :  { %vm229_vm6 = vcmp.lt.s32.totalorder %v1243_v16, 0  ;;  %v295_v9 = vclz %v1027_v56  ;;  %v368_v8 = vsel %vm364_vm4, %v352_v33, %v367_v2  ;;  %v371_v10 = vsel %vm365_vm2, %v358_v36, 920167782 }
  0x65   :  { %v203_v42 = vor.u32 4788187, %v202_v35  ;;  %v206_v39 = vcvt.s32.f32 %v199_v32  ;;  %v369_v11 = vsel %vm363_vm5, %v366_v0, %v368_v8  ;;  %v372_v26 = vsel %vm364_vm4, %v355_v18, %v371_v10 }
  0x66   :  { %v374_v12 = vsel %vm362_vm1, %v352_v33, %v355_v18  ;;  %v375_v14 = vsel %vm365_vm2, %v361_v50, 1326507024  ;;  %vm96_vm7 = vcmp.eq.f32.partialorder %v1290_v29, 0.0  ;;  %vm103_vm8 = vcmp.eq.f32.partialorder %v1317_v59, 0.0 }
  0x67   :  { %v204_v51 = vand.u32 2147483647, %v203_v42  ;;  %v1028_v17 = vadd.s32 4294967294, %v295_v9  ;;  %v373_v19 = vsel %vm363_vm5, %v370_v5, %v372_v26  ;;  %v376_v21 = vsel %vm364_vm4, %v358_v36, %v375_v14 }
  0x68   :  { %v377_v20 = vsel %vm363_vm5, %v374_v12, %v376_v21  ;;  %v1414_v23 = vmul.u32.u64.low %v378_v45, %v373_v19  ;;  %v1415_v24 = vmul.u32.u64.high %v378_v45, %v373_v19, %v1414_v23  ;;  %v437_v25 = vshrl.u32 %v436_v61, 23 }
  0x69   :  { %v207_v6 = vmul.f32 %v206_v39, %v204_v51  ;;  %vm1029_vm9 = vcmp.lt.s32.totalorder %v1028_v17, 0  ;;  %v1420_v32 = vmul.u32.u64.low %v378_v45, %v377_v20  ;;  %v1421_v35 = vmul.u32.u64.high %v378_v45, %v377_v20, %v1420_v32 }
  0x6a   :  { %v298_v41 = vsel %vm1029_vm9, 0, %v1028_v17  ;;  %v313_v22 = vsub.s32 4, %v1373_v27  ;;  %v385_v33 = vmul.u32 %v378_v45, %v369_v11  ;;  %v211_v39 = vsel %vm126_vm15, %v210_v3, %v1323_v7 }
  0x6b   :  { %v208_v15 = vxor.u32 2147483648, %v207_v6  ;;  %v299_v36 = vsub.s32 32, %v298_v41  ;;  %v300_v43 = vshll.u32 %v1391_v38, %v298_v41  ;;  %v303_v42 = vsub.s32 4294967266, %v298_v41 }
  0x6c   :  { %v388_v49 = vadd.s32 1, %v1415_v24  ;;  %v433_v18 = vand.u32 2147483647, %v1354_v54  ;;  %v1437_v45 = vmul.f32 -2.0, %v1363_v1  ;;  %vm387_vm10 = vc.u32 %v1421_v35, %v1414_v23 }
  0x6d   :  { %v209_v28 = vsel %vm126_vm15, %v208_v15, %v207_v6  ;;  %v301_v50 = vshrl.u32 %v1370_v52, %v299_v36  ;;  %v304_v51 = vadd.s32 127, %v303_v42  ;;  %v102_v38 = vsel %vm101_vm3, %v1317_v59, %v1367_v4 }
  0x6e   :  { %v212_v40 = vsel %vm1387_vm0, %v1241_v13, %v209_v28  ;;  %v314_v7 = vsel %vm229_vm6, %v313_v22, %v1373_v27  ;;  %v389_v3 = vsel %vm387_vm10, %v388_v49, %v1415_v24  ;;  %v1034_v56 = vadd.s32 4294967169, %v437_v25 }
  0x6f   :  { %1091 = vcosq.f32 %v212_v40  ;;  %v213_v52 = vsel %vm1387_vm0, 0, %v211_v39  ;;  %v302_v1 = vor.u32 %v301_v50, %v300_v43  ;;  %v305_v61 = vshll.u32 %v304_v51, 23 }
  0x70   :  { %1093 = vsinq.f32 %v212_v40  ;;  %v390_v0 = vadd.s32 %v389_v3, %v385_v33  ;;  %v217_v2 = vand.u32 3, %v213_v52  ;;  %vm1453_vm11 = vcmp.le.f32.partialorder %v227_v31, 0.7853982 }
  0x71   :  { %v440_v4 = vand.u32 8388607, %v433_v18  ;;  %v443_v27 = vadd.s32 1, %v1034_v56  ;;  %v306_v6 = vor.u32 4788187, %v305_v61  ;;  %v309_v9 = vcvt.s32.f32 %v302_v1 }
  0x72   :  { %v316_v30 = vsel %vm1453_vm11, 0, %v314_v7  ;;  %v391_v8 = vadd.s32 536870912, %v390_v0  ;;  %v1466_v10 = vsel %vm96_vm7, %v97_v55, %v1359_v62  ;;  %vm216_vm12 = vweird.f32 %v1241_v13 }
  0x73   :  { %v1473_v31 = vsel %vm103_vm8, %v104_v58, %v102_v38  ;;  %vm444_vm13 = vcmp.gt.s32.totalorder %v443_v27, 0  ;;  %v307_v11 = vand.u32 2147483647, %v306_v6  ;;  %1095 = vrsqrt.f32 %v1437_v45 }
  0x74   :  { %v1476_v26 = vshrl.u32 %v391_v8, 30  ;;  %v445_v12 = vsel %vm444_vm13, %v443_v27, 0  ;;  %v441_v14 = vor.u32 8388608, %v440_v4  ;;  %v633_v29 = vadd.s32 3, %v213_v52 }
  0x75   :  { %v447_v15 = vand.u32 31, %v445_v12  ;;  %v737_v55 = vadd.s32 3, %v316_v30  ;;  %vm218_vm14 = vcmp.lt.s32.totalorder %v217_v2, 2  ;;  %vm222_vm15 = vcmp.eq.s32.totalorder %v217_v2, 2 }
  0x76   :  { %v310_v17 = vmul.f32 %v309_v9, %v307_v11  ;;  %v393_v59 = vshll.u32 %v1476_v26, 30  ;;  %vm219_vm0 = vcmp.eq.s32.totalorder %v217_v2, 0  ;;  %v1484_v21 = vand.u32 3, %v316_v30 }
  0x77   :  { %v448_v20 = vsub.s32 32, %v447_v15  ;;  %v1489_v28 = vadd.s32 %v1414_v23, %v1421_v35  ;;  %v1496_v41 = vshll.u32 %v441_v14, 8  ;;  %v1498_v22 = vand.u32 3, %v633_v29 }
  0x78   :  { %v311_v25 = vxor.u32 2147483648, %v310_v17  ;;  %v1491_v32 = vsub.s32 %v390_v0, %v393_v59  ;;  %v1500_v33 = vand.u32 3, %v737_v55  ;;  %v450_v43 = vshll.u32 %v1189_v44, %v447_v15 }
  0x79   :  { %v1478_v62 = vpop.eup %1091  ;;  %v1513_v49 = vshrl.u32 %v445_v12, 5  ;;  %v451_v50 = vshrl.u32 %v1190_v46, %v448_v20  ;;  %v453_v7 = vshll.u32 %v1190_v46, %v447_v15  ;;  %v416_v56 = vsub.s32 4, %v1476_v26 }
  0x7a   :  { %v1481_v58 = vpop.eup %1093  ;;  %v223_v19 = vxor.u32 2147483648, %v1478_v62  ;;  %v312_v23 = vsel %vm229_vm6, %v311_v25, %v310_v17  ;;  %v396_v35 = vsub.s32 0, %v1491_v32  ;;  %v449_v52 = vshrl.u32 %v1189_v44, %v448_v20  ;;  %v960_v44 = vld [vmem:[#allocation2] sm:$0xff] }
  0x7b   :  { %v220_v24 = vxor.u32 2147483648, %v1481_v58  ;;  %v315_v39 = vsel %vm1453_vm11, %v1243_v16, %v312_v23  ;;  %vm325_vm1 = vcmp.eq.s32.totalorder %v1484_v21, 2  ;;  %v452_v0 = vor.u32 %v451_v50, %v450_v43 }
  0x7c   :  { %v224_v40 = vsel %vm222_vm15, %v223_v19, %v1481_v58  ;;  %1097 = vcosq.f32 %v315_v39  ;;  %v1031_v38 = vmin.u32 %v396_v35, %v1491_v32  ;;  %v454_v2 = vshrl.u32 %v1191_v48, %v448_v20 }
  0x7d   :  { %v221_v36 = vsel %vm219_vm0, %v1478_v62, %v220_v24  ;;  %1099 = vsinq.f32 %v315_v39  ;;  %v1523_v1 = vpop.eup %1095  ;;  %v456_v5 = vshll.u32 %v1191_v48, %v447_v15  ;;  %vm322_vm2 = vcmp.eq.s32.totalorder %v1484_v21, 0 }
  0x7e   :  { %v225_v42 = vsel %vm218_vm14, %v221_v36, %v224_v40  ;;  %v398_v61 = vclz %v1031_v38  ;;  %v457_v46 = vshrl.u32 %v1192_v57, %v448_v20  ;;  %v459_v27 = vshll.u32 %v1192_v57, %v447_v15 }
  0x7f   :  { %v226_v51 = vsel %vm216_vm12, nan, %v225_v42  ;;  %v460_v6 = vshrl.u32 %v1193_v60, %v448_v20  ;;  %vm636_vm3 = vcmp.eq.s32.totalorder %v1498_v22, 0  ;;  %vm321_vm4 = vcmp.lt.s32.totalorder %v1484_v21, 2 }
  0x80   :  { %v536_v3 = vmul.f32 %v226_v51, %v1466_v10  ;;  %v1032_v9 = vadd.s32 4294967294, %v398_v61  ;;  %v455_v30 = vor.u32 %v454_v2, %v453_v7  ;;  %v462_v8 = vshll.u32 %v1193_v60, %v447_v15 }
  0x81   :  { %v463_v48 = vshrl.u32 %v1194_v63, %v448_v20  ;;  %vm639_vm5 = vcmp.eq.s32.totalorder %v1498_v22, 2  ;;  %vm319_vm6 = vweird.f32 %v1243_v16  ;;  %v458_v12 = vor.u32 %v457_v46, %v456_v5 }
  0x82   :  { %v968_v4 = vmul.f32 0.1, %v536_v3  ;;  %v461_v57 = vor.u32 %v460_v6, %v459_v27  ;;  %vm465_vm7 = vcmp.lt.s32.totalorder %v1513_v49, 1  ;;  %vm635_vm8 = vcmp.lt.s32.totalorder %v1498_v22, 2 }
  0x83   :  { %vm740_vm9 = vcmp.eq.s32.totalorder %v1500_v33, 0  ;;  %vm1033_vm10 = vcmp.lt.s32.totalorder %v1032_v9, 0  ;;  %v464_v14 = vor.u32 %v463_v48, %v462_v8  ;;  %vm466_vm11 = vcmp.lt.s32.totalorder %v1513_v49, 2 }
  0x84   :  { %v976_v11 = vadd.f32 1.0, %v968_v4  ;;  %vm467_vm13 = vcmp.lt.s32.totalorder %v1513_v49, 3  ;;  %v401_v63 = vsel %vm1033_vm10, 0, %v1032_v9  ;;  %vm468_vm14 = vcmp.lt.s32.totalorder %v1513_v49, 4 }
  0x85   :  { %v469_v15 = vsel %vm465_vm7, %v449_v52, %v452_v0  ;;  %v402_v29 = vsub.s32 32, %v401_v63  ;;  %v403_v55 = vshll.u32 %v1491_v32, %v401_v63  ;;  %v406_v17 = vsub.s32 4294967266, %v401_v63 }
  0x86   :  { %v984_v60 = vmul.f32 %v976_v11, %v960_v44  ;;  %v470_v59 = vsel %vm468_vm14, %v458_v12, 2102212464  ;;  %vm739_vm15 = vcmp.lt.s32.totalorder %v1500_v33, 2  ;;  %v473_v25 = vsel %vm465_vm7, %v452_v0, %v455_v30  ;;  %v1098_v32 = vpop.eup %1097 }
  0x87   :  { %v471_v20 = vsel %vm467_vm13, %v455_v30, %v470_v59  ;;  %v474_v40 = vsel %vm468_vm14, %v461_v57, 920167782  ;;  %v477_v36 = vsel %vm465_vm7, %v455_v30, %v458_v12  ;;  %vm332_vm0 = vcmp.lt.s32.totalorder %v1264_v53, 0  ;;  %v1100_v39 = vpop.eup %1099  ;;  %v964_v59 = vld [vmem:[#allocation2 + $0x20] sm:$0xff] }
  0x88   :  { %992 = vst [vmem:[#allocation7] sm:$0xff] %v984_v60  ;;  %v404_v23 = vshrl.u32 %v1489_v28, %v402_v29  ;;  %v407_v35 = vadd.s32 127, %v406_v17  ;;  %v472_v43 = vsel %vm466_vm11, %v469_v15, %v471_v20  ;;  %v475_v42 = vsel %vm467_vm13, %v458_v12, %v474_v40  ;;  %v961_v60 = vld [vmem:[#allocation2 + $0x8] sm:$0xff] }
  0x89   :  { %v326_v50 = vxor.u32 2147483648, %v1098_v32  ;;  %v476_v51 = vsel %vm466_vm11, %v473_v25, %v475_v42  ;;  %v478_v38 = vsel %vm468_vm14, %v464_v14, 1326507024  ;;  %v488_v7 = vmul.u32 %v1496_v41, %v472_v43 }
  0x8a   :  { %v323_v3 = vxor.u32 2147483648, %v1100_v39  ;;  %v405_v52 = vor.u32 %v404_v23, %v403_v55  ;;  %v408_v28 = vshll.u32 %v407_v35, 23  ;;  %v479_v61 = vsel %vm467_vm13, %v461_v57, %v478_v38 }
  0x8b   :  { %v327_v0 = vsel %vm325_vm1, %v326_v50, %v1100_v39  ;;  %v480_v2 = vsel %vm466_vm11, %v477_v36, %v479_v61  ;;  %v1576_v5 = vmul.u32.u64.low %v1496_v41, %v476_v51  ;;  %v1577_v4 = vmul.u32.u64.high %v1496_v41, %v476_v51, %v1576_v5 }
  0x8c   :  { %v324_v46 = vsel %vm322_vm2, %v1098_v32, %v323_v3  ;;  %v409_v27 = vor.u32 4788187, %v408_v28  ;;  %v412_v6 = vcvt.s32.f32 %v405_v52  ;;  %v638_v44 = vsel %vm636_vm3, %v1478_v62, %v220_v24 }
  0x8d   :  { %v328_v49 = vsel %vm321_vm4, %v324_v46, %v327_v0  ;;  %v1590_v9 = vmul.u32.u64.low %v1496_v41, %v480_v2  ;;  %v1591_v30 = vmul.u32.u64.high %v1496_v41, %v480_v2, %v1590_v9  ;;  %v641_v8 = vsel %vm639_vm5, %v223_v19, %v1481_v58 }
  0x8e   :  { %v329_v48 = vsel %vm319_vm6, nan, %v328_v49  ;;  %v410_v11 = vand.u32 2147483647, %v409_v27  ;;  %v642_v24 = vsel %vm635_vm8, %v638_v44, %v641_v8  ;;  %v742_v21 = vsel %vm740_vm9, %v1098_v32, %v323_v3 }
  0x8f   :  { %v537_v12 = vmul.f32 %v329_v48, %v1473_v31  ;;  %v491_v41 = vadd.s32 1, %v1577_v4  ;;  %v643_v62 = vsel %vm216_vm12, nan, %v642_v24  ;;  %vm743_vm1 = vcmp.eq.s32.totalorder %v1500_v33, 2 }
  0x90   :  { %vm1611_vm2 = vcmp.le.f32.partialorder %v330_v34, 0.7853982  ;;  %v413_v19 = vmul.f32 %v412_v6, %v410_v11  ;;  %v956_v22 = vmul.f32 %v643_v62, %v1466_v10  ;;  %v745_v57 = vsel %vm743_vm1, %v326_v50, %v1100_v39 }
  0x91   :  { %v969_v14 = vmul.f32 0.1, %v537_v12  ;;  %v417_v13 = vsel %vm332_vm0, %v416_v56, %v1476_v26  ;;  %vm490_vm12 = vc.u32 %v1591_v30, %v1576_v5  ;;  %v746_v34 = vsel %vm739_vm15, %v742_v21, %v745_v57 }
  0x92   :  { %v414_v63 = vxor.u32 2147483648, %v413_v19  ;;  %v492_v15 = vsel %vm490_vm12, %v491_v41, %v1577_v4  ;;  %v972_v29 = vmul.f32 0.1, %v956_v22  ;;  %v747_v10 = vsel %vm319_vm6, nan, %v746_v34 }
  0x93   :  { %v977_v55 = vadd.f32 1.0, %v969_v14  ;;  %v493_v17 = vadd.s32 %v492_v15, %v488_v7  ;;  %v957_v20 = vmul.f32 %v747_v10, %v1473_v31  ;;  %v419_v33 = vsel %vm1611_vm2, 0, %v417_v13  ;;  %v965_v31 = vld [vmem:[#allocation2 + $0x28] sm:$0xff] }
  0x94   :  { %v415_v26 = vsel %vm332_vm0, %v414_v63, %v413_v19  ;;  %v55_v56 = vor.u32 1065353216, %v51_v47  ;;  %v980_v25 = vadd.f32 1.0, %v972_v29  ;;  %v841_v37 = vadd.s32 3, %v419_v33 }
  0x95   :  { %v985_v40 = vmul.f32 %v977_v55, %v961_v60  ;;  %v418_v16 = vsel %vm1611_vm2, %v1264_v53, %v415_v26  ;;  %v494_v36 = vadd.s32 536870912, %v493_v17  ;;  %v973_v32 = vmul.f32 0.1, %v957_v20  ;;  %v962_v60 = vld [vmem:[#allocation2 + $0x10] sm:$0xff] }
  0x96   :  { %1101 = vcosq.f32 %v418_v16  ;;  %v988_v23 = vmul.f32 %v980_v25, %v964_v59  ;;  %v75_v42 = vsub.f32 2.0, %v55_v56  ;;  %v107_v51 = vmul.f32 %v1523_v1, %v1437_v45 }
  0x97   :  { %993 = vst [vmem:[#allocation7 + $0x8] sm:$0xff] %v985_v40  ;;  %1103 = vsinq.f32 %v418_v16  ;;  %v1638_v35 = vshrl.u32 %v494_v36, 30  ;;  %v981_v43 = vadd.f32 1.0, %v973_v32  ;;  %v423_v38 = vand.u32 3, %v419_v33 }
  0x98   :  { %996 = vst [vmem:[#allocation7 + $0x20] sm:$0xff] %v988_v23  ;;  %1105 = vlog2.f32 %v75_v42  ;;  %v842_v7 = vand.u32 3, %v841_v37  ;;  %vm108_vm3 = vcmp.eq.f32.partialorder %v1437_v45, inf  ;;  %vm110_vm4 = vcmp.eq.f32.partialorder %v1437_v45, 0.0 }
  0x99   :  { %v496_v47 = vshll.u32 %v1638_v35, 30  ;;  %v989_v39 = vmul.f32 %v981_v43, %v965_v31  ;;  %v109_v61 = vsel %vm108_vm3, %v1437_v45, %v107_v51  ;;  %v111_v0 = vand.u32 2147483648, %v1437_v45 }
  0x9a   :  { %vm428_vm5 = vcmp.eq.s32.totalorder %v423_v38, 2  ;;  %vm847_vm6 = vcmp.eq.s32.totalorder %v842_v7, 2  ;;  %vm425_vm7 = vcmp.eq.s32.totalorder %v423_v38, 0  ;;  %vm844_vm8 = vcmp.eq.s32.totalorder %v842_v7, 0 }
  0x9b   :  { %v497_v50 = vsub.s32 %v493_v17, %v496_v47  ;;  %997 = vst [vmem:[#allocation7 + $0x28] sm:$0xff] %v989_v39  ;;  %vm424_vm9 = vcmp.lt.s32.totalorder %v423_v38, 2  ;;  %vm843_vm10 = vcmp.lt.s32.totalorder %v842_v7, 2  ;;  %vm422_vm11 = vweird.f32 %v1264_v53 }
  0x9c   :  { %v112_v49 = vsel %vm110_vm4, %v111_v0, %v109_v61  ;;  %v489_v11 = vadd.s32 %v1576_v5, %v1591_v30  ;;  %v966_v30 = vld [vmem:[#allocation2 + $0x30] sm:$0xff]  ;;  %v519_v56 = vsub.s32 4, %v1638_v35  ;;  %vm435_vm14 = vcmp.lt.s32.totalorder %v1354_v54, 0 }
  0x9d   :  { %v499_v3 = vsub.s32 0, %v497_v50  ;;  %vm434_vm15 = vcmp.le.f32.partialorder %v433_v18, 0.7853982 }
  0x9e   :  { %v520_v16 = vsel %vm435_vm14, %v519_v56, %v1638_v35 }
  0x9f   :  { %v1035_v52 = vmin.u32 %v499_v3, %v497_v50  ;;  %v522_v23 = vsel %vm434_vm15, 0, %v520_v16 }
  0xa0   :  { %v1102_v28 = vpop.eup %1101  ;;  %v945_v31 = vadd.s32 3, %v522_v23  ;;  %v526_v42 = vand.u32 3, %v522_v23 }
  0xa1   :  { %v1104_v2 = vpop.eup %1103  ;;  %v429_v4 = vxor.u32 2147483648, %v1102_v28  ;;  %v501_v1 = vclz %v1035_v52 }
  0xa2   :  { %v426_v46 = vxor.u32 2147483648, %v1104_v2  ;;  %v1106_v21 = vpop.eup %1105  ;;  %v946_v37 = vand.u32 3, %v945_v31  ;;  %vm531_vm2 = vcmp.eq.s32.totalorder %v526_v42, 2  ;;  %vm528_vm3 = vcmp.eq.s32.totalorder %v526_v42, 0 }
  0xa3   :  { %v430_v27 = vsel %vm428_vm5, %v429_v4, %v1104_v2  ;;  %v1036_v6 = vadd.s32 4294967294, %v501_v1  ;;  %v849_v44 = vsel %vm847_vm6, %v429_v4, %v1104_v2  ;;  %v87_v45 = vmul.f32 0.6931472, %v1106_v21 }
  0xa4   :  { %v427_v9 = vsel %vm425_vm7, %v1102_v28, %v426_v46  ;;  %v846_v8 = vsel %vm844_vm8, %v1102_v28, %v426_v46  ;;  %vm951_vm12 = vcmp.eq.s32.totalorder %v946_v37, 2  ;;  %vm948_vm4 = vcmp.eq.s32.totalorder %v946_v37, 0 }
  0xa5   :  { %v431_v48 = vsel %vm424_vm9, %v427_v9, %v430_v27  ;;  %vm1037_vm13 = vcmp.lt.s32.totalorder %v1036_v6, 0  ;;  %v850_v24 = vsel %vm843_vm10, %v846_v8, %v849_v44  ;;  %v91_v17 = vmul.f32 -2.0, %v87_v45  ;;  %v967_v9 = vld [vmem:[#allocation2 + $0x38] sm:$0xff] }
  0xa6   :  { %v432_v12 = vsel %vm422_vm11, nan, %v431_v48  ;;  %v504_v41 = vsel %vm1037_vm13, 0, %v1036_v6  ;;  %v851_v62 = vsel %vm422_vm11, nan, %v850_v24  ;;  %vm527_vm5 = vcmp.lt.s32.totalorder %v526_v42, 2 }
  0xa7   :  { %v538_v58 = vmul.f32 %v432_v12, %v112_v49  ;;  %v505_v53 = vsub.s32 32, %v504_v41  ;;  %v506_v19 = vshll.u32 %v497_v50, %v504_v41  ;;  %v509_v22 = vsub.s32 4294967266, %v504_v41 }
  0xa8   :  { %v958_v57 = vmul.f32 %v851_v62, %v112_v49  ;;  %1107 = vrsqrt.f32 %v91_v17  ;;  %vm115_vm0 = vcmp.eq.f32.partialorder %v91_v17, inf  ;;  %vm117_vm1 = vcmp.eq.f32.partialorder %v91_v17, 0.0  ;;  %v963_v49 = vld [vmem:[#allocation2 + $0x18] sm:$0xff] }
  0xa9   :  { %v970_v14 = vmul.f32 0.1, %v538_v58  ;;  %v507_v13 = vshrl.u32 %v489_v11, %v505_v53  ;;  %v510_v34 = vadd.s32 127, %v509_v22  ;;  %v118_v50 = vand.u32 2147483648, %v91_v17 }
  0xaa   :  { %v974_v63 = vmul.f32 0.1, %v958_v57  ;;  %vm947_vm6 = vcmp.lt.s32.totalorder %v946_v37, 2  ;;  %vm525_vm7 = vweird.f32 %v1354_v54 }
  0xab   :  { %v978_v15 = vadd.f32 1.0, %v970_v14  ;;  %v508_v29 = vor.u32 %v507_v13, %v506_v19  ;;  %v511_v5 = vshll.u32 %v510_v34, 23 }
  0xac   :  { %v982_v10 = vadd.f32 1.0, %v974_v63 }
  0xad   :  { %v986_v55 = vmul.f32 %v978_v15, %v962_v60  ;;  %v512_v59 = vor.u32 4788187, %v511_v5  ;;  %v515_v20 = vcvt.s32.f32 %v508_v29 }
  0xae   :  { %v990_v26 = vmul.f32 %v982_v10, %v966_v30 }
  0xaf   :  { %994 = vst [vmem:[#allocation7 + $0x10] sm:$0xff] %v986_v55  ;;  %v513_v33 = vand.u32 2147483647, %v512_v59 }
  0xb0   :  { %998 = vst [vmem:[#allocation7 + $0x30] sm:$0xff] %v990_v26 }
  0xb1   :  { %v516_v25 = vmul.f32 %v515_v20, %v513_v33 }
  0xb2   :  { %v1108_v43 = vpop.eup %1107 }
  0xb3   :  { %v517_v40 = vxor.u32 2147483648, %v516_v25  ;;  %v114_v47 = vmul.f32 %v1108_v43, %v91_v17 }
  0xb5   :  { %v518_v36 = vsel %vm435_vm14, %v517_v40, %v516_v25  ;;  %v116_v51 = vsel %vm115_vm0, %v91_v17, %v114_v47 }
  0xb6   :  { %v521_v32 = vsel %vm434_vm15, %v1354_v54, %v518_v36  ;;  %v119_v52 = vsel %vm117_vm1, %v118_v50, %v116_v51 }
  0xb7   :  { %1109 = vcosq.f32 %v521_v32 }
  0xb8   :  { %1111 = vsinq.f32 %v521_v32 }
  0xc1   :  { %v1110_v39 = vpop.eup %1109 }
  0xc2   :  { %v1112_v18 = vpop.eup %1111  ;;  %v532_v35 = vxor.u32 2147483648, %v1110_v39 }
  0xc3   :  { %v529_v38 = vxor.u32 2147483648, %v1112_v18 }
  0xc4   :  { %v533_v7 = vsel %vm531_vm2, %v532_v35, %v1112_v18  ;;  %v953_v3 = vsel %vm951_vm12, %v532_v35, %v1112_v18 }
  0xc5   :  { %v530_v28 = vsel %vm528_vm3, %v1110_v39, %v529_v38  ;;  %v950_v61 = vsel %vm948_vm4, %v1110_v39, %v529_v38 }
  0xc6   :  { %v534_v0 = vsel %vm527_vm5, %v530_v28, %v533_v7  ;;  %v954_v2 = vsel %vm947_vm6, %v950_v61, %v953_v3 }
  0xc7   :  { %v535_v4 = vsel %vm525_vm7, nan, %v534_v0  ;;  %v955_v1 = vsel %vm525_vm7, nan, %v954_v2 }
  0xc8   :  { %v539_v46 = vmul.f32 %v535_v4, %v119_v52  ;;  %v959_v27 = vmul.f32 %v955_v1, %v119_v52 }
  0xca   :  { %v971_v6 = vmul.f32 0.1, %v539_v46  ;;  %v975_v44 = vmul.f32 0.1, %v959_v27 }
  0xcc   :  { %v979_v8 = vadd.f32 1.0, %v971_v6  ;;  %v983_v48 = vadd.f32 1.0, %v975_v44 }
  0xce   :  { %v987_v54 = vmul.f32 %v979_v8, %v963_v49  ;;  %v991_v11 = vmul.f32 %v983_v48, %v967_v9 }
  0xd0   :  { %995 = vst [vmem:[#allocation7 + $0x18] sm:$0xff] %v987_v54  ;;  %999 = vst [vmem:[#allocation7 + $0x38] sm:$0xff] %v991_v11 }
  0xd1   :  { %1168 = shalt.err (!%p1165_p6)
}
  0xd2   :  { %s1169_s10 = scalar_lea.hbm %s1676_s2, 1024 }
  0xd3   :  { %p1170_p7 = scmp.ne.s32.totalorder %s1676_s2, %s1169_s10  ;;  %p1173_p8 = scmp.lt.u32.totalorder %s1169_s10, %s1676_s2 }
  0xd5   :  { %p1175_p9 = pnand %p1173_p8, %p1170_p7 }
  0xd7   :  { %1178 = shalt.err (!%p1175_p9)
}
  0xd8   :  { %1011 = dma.vmem_to_hbm [thread:$0]  %s1006_s6, 1024, %s1676_s2, [#allocation4], %s1186_s19, %s1186_s19, %s1187_s20  }
  0xd9   :  { %1183 = dma.done.wait [#allocation4], 1024  }
  0xda   :  { %1184 = vsyncadd [#allocation4], 4294966272 }
  0xdb   :  { %1015 = vsyncpa [#allocation3], 1 }
  0xdc   :  { %1016 = vsyncpa [#allocation6], 1 }
  0xdd   :  { %1017 = vsyncpa [#allocation4], 1 }

</bundles_post_ra>
